<compile_context>
chip_gen: v6e
topology: v6e:2x2x1
jax: 0.10.0
libtpu: 0.0.40
codegen_flags: <defaults>
</compile_context>

<pallas_src>
import functools

import jax
import jax.numpy as jnp
from jax.experimental import pallas as pl
from jax.experimental.pallas import tpu as pltpu


def _round_up(x, m):
    return ((x + m - 1) // m) * m


def _world_model_kernel(xs_ref, xa_ref, w1s_ref, w1a_ref, w_ref, b_ref,
                        out_ref, *, state_size):
    """xs_ref: (TB, S); xa_ref: (TB, A); w1s_ref: (S, P); w1a_ref: (A, P);
       w_ref: (3, P, P); b_ref: (4, P); out_ref: (TB, state_size + 2)."""
    f32 = jnp.float32

    # Layer 1 (fused fc1_s + fc1_a): two narrow-K dots into disjoint lanes of the
    # P-wide hidden slab (block-diagonal fusion; ReLU is per-lane, so exact).
    h = (jnp.dot(xs_ref[...], w1s_ref[...], preferred_element_type=f32)
         + jnp.dot(xa_ref[...], w1a_ref[...], preferred_element_type=f32)
         + b_ref[0:1, :])
    h = jnp.maximum(h, 0.0)

    # fc2 -> relu
    h = jnp.dot(h, w_ref[0], preferred_element_type=f32) + b_ref[1:2, :]
    h = jnp.maximum(h, 0.0)

    # fch -> relu
    h = jnp.dot(h, w_ref[1], preferred_element_type=f32) + b_ref[2:3, :]
    h = jnp.maximum(h, 0.0)

    # Fused heads [fc3 | fc4 | fc5 | 0-pad]: keep the MXU matmul 128 lanes wide,
    # store only the state_size + 2 useful lanes (narrow HBM writeback).
    heads = jnp.dot(h, w_ref[2], preferred_element_type=f32) + b_ref[3:4, :]

    out_ref[:, :state_size + 1] = heads[:, :state_size + 1]
    # Sigmoid only on the single 'done' column -> minimal EUP work.
    out_ref[:, state_size + 1:state_size + 2] = jax.nn.sigmoid(
        heads[:, state_size + 1:state_size + 2])


def _linear_params(key, fan_in, fan_out):
    """PyTorch nn.Linear-style init (uniform +/- 1/sqrt(fan_in)); weight stored (in, out)."""
    kw, kb = jax.random.split(key)
    bound = 1.0 / jnp.sqrt(jnp.float32(fan_in))
    w = jax.random.uniform(kw, (fan_in, fan_out), jnp.float32, -bound, bound)
    b = jax.random.uniform(kb, (1, fan_out), jnp.float32, -bound, bound)
    return w, b


def make_world_model(state_size, action_size, fc1_units=64, fc2_units=64, seed=0):
    units = fc2_units + 1
    key = jax.random.PRNGKey(seed)
    keys = jax.random.split(key, 7)

    w1s, b1s = _linear_params(keys[0], state_size, fc1_units)
    w1a, b1a = _linear_params(keys[1], action_size, 1)
    w2, b2 = _linear_params(keys[2], units, units)
    wh, bh = _linear_params(keys[3], units, units)
    w3, b3 = _linear_params(keys[4], units, state_size)
    w4, b4 = _linear_params(keys[5], units, 1)
    w5, b5 = _linear_params(keys[6], units, 1)

    params = (w1s, b1s, w1a, b1a, w2, b2, wh, bh, w3, b3, w4, b4, w5, b5)

    # -------- pack parameters into lane-aligned, fused operands (done once) --------
    P = _round_up(max(units, state_size + 2), 128)

    # layer 1: w1s -> hidden lanes [0:fc1_units]; w1a -> hidden lane fc1_units
    w1s_pad = jnp.zeros((state_size, P), jnp.float32).at[:, :fc1_units].set(w1s)
    w1a_pad = jnp.zeros((action_size, P), jnp.float32).at[
        :, fc1_units:fc1_units + 1].set(w1a)

    w2_full = jnp.zeros((P, P), jnp.float32).at[:units, :units].set(w2)
    wh_full = jnp.zeros((P, P), jnp.float32).at[:units, :units].set(wh)

    # heads: [w3 | w4 | w5 | 0-pad] -> lanes [0:state_size], state_size, state_size+1
    wheads_full = jnp.zeros((P, P), jnp.float32)
    wheads_full = wheads_full.at[:units, :state_size].set(w3)
    wheads_full = wheads_full.at[:units, state_size:state_size + 1].set(w4)
    wheads_full = wheads_full.at[:units, state_size + 1:state_size + 2].set(w5)

    w_packed = jnp.stack([w2_full, wh_full, wheads_full])  # (3, P, P)

    b_packed = jnp.zeros((4, P), jnp.float32)
    b_packed = b_packed.at[0, :fc1_units].set(b1s[0])
    b_packed = b_packed.at[0, fc1_units].set(b1a[0, 0])
    b_packed = b_packed.at[1, :units].set(b2[0])
    b_packed = b_packed.at[2, :units].set(bh[0])
    b_packed = b_packed.at[3, :state_size].set(b3[0])
    b_packed = b_packed.at[3, state_size].set(b4[0, 0])
    b_packed = b_packed.at[3, state_size + 1].set(b5[0, 0])

    kernel = functools.partial(_world_model_kernel, state_size=state_size)
    out_w = state_size + 2

    @jax.jit
    def forward(state, action):
        B = state.shape[0]
        # Batch tile: multiple of 8 sublanes, big enough to amortize per-step
        # overhead (cap 2048 keeps worst-case VMEM ~10 MiB), and ~ceil(B/2) so
        # the "parallel" grid has >= 2 steps for v7x's two TensorCores.
        tile_b = min(_round_up(pl.cdiv(B, 2), 8), 2048)
        b_pad = _round_up(B, tile_b)

        if b_pad != B:
            pad = b_pad - B
            state_in = jnp.pad(state, ((0, pad), (0, 0)))
            action_in = jnp.pad(action, ((0, pad), (0, 0)))
        else:
            state_in, action_in = state, action

        out = pl.pallas_call(
            kernel,
            out_shape=jax.ShapeDtypeStruct((b_pad, out_w), jnp.float32),
            grid_spec=pltpu.PrefetchScalarGridSpec(
                num_scalar_prefetch=0,
                grid=(b_pad // tile_b,),
                in_specs=[
                    # narrow activation streams (last dim == full array dim)
                    pl.BlockSpec((tile_b, state_size), lambda i: (i, 0)),
                    pl.BlockSpec((tile_b, action_size), lambda i: (i, 0)),
                    # VMEM-resident weights / biases (constant index maps)
                    pl.BlockSpec((state_size, P), lambda i: (0, 0)),
                    pl.BlockSpec((action_size, P), lambda i: (0, 0)),
                    pl.BlockSpec((3, P, P), lambda i: (0, 0, 0)),
                    pl.BlockSpec((4, P), lambda i: (0, 0)),
                ],
                out_specs=pl.BlockSpec((tile_b, out_w), lambda i: (i, 0)),
            ),
            compiler_params=pltpu.CompilerParams(
                dimension_semantics=("parallel",)),
        )(state_in, action_in, w1s_pad, w1a_pad, w_packed, b_packed)

        next_state = out[:B, :state_size]
        reward = out[:B, state_size:state_size + 1]
        done = out[:B, state_size + 1:state_size + 2]  # sigmoid applied in-kernel
        return next_state, reward, done

    return forward, params


def _reference_forward(state, action, params):
    (w1s, b1s, w1a, b1a, w2, b2, wh, bh, w3, b3, w4, b4, w5, b5) = params
    xs = jnp.maximum(state @ w1s + b1s, 0.0)
    xa = jnp.maximum(action @ w1a + b1a, 0.0)
    x = jnp.concatenate([xs, xa], axis=-1)
    x = jnp.maximum(x @ w2 + b2, 0.0)
    x = jnp.maximum(x @ wh + bh, 0.0)
    return x @ w3 + b3, x @ w4 + b4, jax.nn.sigmoid(x @ w5 + b5)


if __name__ == "__main__":
    # Small shapes consistent with the module.
    batch = 8
    state_size = 8
    action_size = 4
    fc1_units = 32
    fc2_units = 32   # units = 33 -> hidden padded to 128 inside the kernel

    forward, params = make_world_model(
        state_size, action_size, fc1_units=fc1_units, fc2_units=fc2_units, seed=0
    )

    key = jax.random.PRNGKey(0)
    ks, ka = jax.random.split(key)
    state = jax.random.normal(ks, (batch, state_size), jnp.float32)
    # PyTorch's forward feeds `action` (width action_size) directly into fc1_a;
    # emulate with one-hot encoded actions (cf. encode_action).
    action_idx = jax.random.randint(ka, (batch,), 0, action_size)
    action = jax.nn.one_hot(action_idx, action_size, dtype=jnp.float32)

    next_state, reward, done = forward(state, action)
    jax.block_until_ready((next_state, reward, done))

    ref_ns, ref_r, ref_d = _reference_forward(state, action, params)
    assert jnp.allclose(next_state, ref_ns, atol=1e-5, rtol=1e-5)
    assert jnp.allclose(reward, ref_r, atol=1e-5, rtol=1e-5)
    assert jnp.allclose(done, ref_d, atol=1e-5, rtol=1e-5)

    print("KERNEL_OK")
</pallas_src>

<mosaic_0001>
module attributes {stable_mosaic.version = 11 : i64} {
  func.func @_world_model_kernel(%arg0: i32, %arg1: memref<8x8xf32, #tpu.memory_space<vmem>>, %arg2: memref<8x4xf32, #tpu.memory_space<vmem>>, %arg3: memref<8x128xf32, #tpu.memory_space<vmem>>, %arg4: memref<4x128xf32, #tpu.memory_space<vmem>>, %arg5: memref<3x128x128xf32, #tpu.memory_space<vmem>>, %arg6: memref<4x128xf32, #tpu.memory_space<vmem>>, %arg7: memref<8x10xf32, #tpu.memory_space<vmem>>) attributes {dimension_semantics = [#tpu.dimension_semantics<parallel>], iteration_bounds = array<i64: 1>, scalar_prefetch = 0 : i64, scratch_operands = 0 : i64, tpu.core_type = #tpu.core_type<tc>, window_params = [{transform_indices = @transform_0, window_bounds = array<i64: 8, 8>}, {transform_indices = @transform_1, window_bounds = array<i64: 8, 4>}, {pipeline_mode = #tpu.pipeline_mode<synchronous>, transform_indices = @transform_2, window_bounds = array<i64: 8, 128>}, {pipeline_mode = #tpu.pipeline_mode<synchronous>, transform_indices = @transform_3, window_bounds = array<i64: 4, 128>}, {pipeline_mode = #tpu.pipeline_mode<synchronous>, transform_indices = @transform_4, window_bounds = array<i64: 3, 128, 128>}, {pipeline_mode = #tpu.pipeline_mode<synchronous>, transform_indices = @transform_5, window_bounds = array<i64: 4, 128>}, {transform_indices = @transform_6, window_bounds = array<i64: 8, 10>}]} {
    %c0 = arith.constant 0 : index
    %c0_0 = arith.constant 0 : index
    %0 = vector.load %arg1[%c0, %c0_0] : memref<8x8xf32, #tpu.memory_space<vmem>>, vector<8x8xf32>
    %c0_1 = arith.constant 0 : index
    %c0_2 = arith.constant 0 : index
    %1 = vector.load %arg3[%c0_1, %c0_2] : memref<8x128xf32, #tpu.memory_space<vmem>>, vector<8x128xf32>
    %cst = arith.constant dense<0.000000e+00> : vector<8x128xf32>
    %2 = tpu.matmul %0, %1, %cst {dimension_numbers = #tpu.dot_dimension_numbers<[1], [0], [0], [1], [0, 0, 1, 1], [], []>} : vector<8x8xf32>, vector<8x128xf32>, vector<8x128xf32> -> vector<8x128xf32>
    %c0_3 = arith.constant 0 : index
    %c0_4 = arith.constant 0 : index
    %3 = vector.load %arg2[%c0_3, %c0_4] : memref<8x4xf32, #tpu.memory_space<vmem>>, vector<8x4xf32>
    %c0_5 = arith.constant 0 : index
    %c0_6 = arith.constant 0 : index
    %4 = vector.load %arg4[%c0_5, %c0_6] : memref<4x128xf32, #tpu.memory_space<vmem>>, vector<4x128xf32>
    %cst_7 = arith.constant dense<0.000000e+00> : vector<8x128xf32>
    %5 = tpu.matmul %3, %4, %cst_7 {dimension_numbers = #tpu.dot_dimension_numbers<[1], [0], [0], [1], [0, 0, 1, 1], [], []>} : vector<8x4xf32>, vector<4x128xf32>, vector<8x128xf32> -> vector<8x128xf32>
    %6 = arith.addf %2, %5 : vector<8x128xf32>
    %c0_8 = arith.constant 0 : index
    %c0_9 = arith.constant 0 : index
    %7 = vector.load %arg6[%c0_8, %c0_9] : memref<4x128xf32, #tpu.memory_space<vmem>>, vector<1x128xf32>
    %8 = vector.broadcast %7 : vector<1x128xf32> to vector<8x128xf32>
    %9 = arith.addf %6, %8 : vector<8x128xf32>
    %cst_10 = arith.constant 0.000000e+00 : f32
    %10 = vector.broadcast %cst_10 : f32 to vector<8x128xf32>
    %11 = arith.maximumf %9, %10 : vector<8x128xf32>
    %c0_11 = arith.constant 0 : index
    %c0_12 = arith.constant 0 : index
    %c0_13 = arith.constant 0 : index
    %12 = vector.load %arg5[%c0_11, %c0_12, %c0_13] : memref<3x128x128xf32, #tpu.memory_space<vmem>>, vector<1x128x128xf32>
    %13 = vector.shape_cast %12 : vector<1x128x128xf32> to vector<128x128xf32>
    %cst_14 = arith.constant dense<0.000000e+00> : vector<8x128xf32>
    %14 = tpu.matmul %11, %13, %cst_14 {dimension_numbers = #tpu.dot_dimension_numbers<[1], [0], [0], [1], [0, 0, 1, 1], [], []>} : vector<8x128xf32>, vector<128x128xf32>, vector<8x128xf32> -> vector<8x128xf32>
    %c1 = arith.constant 1 : index
    %c0_15 = arith.constant 0 : index
    %15 = vector.load %arg6[%c1, %c0_15] : memref<4x128xf32, #tpu.memory_space<vmem>>, vector<1x128xf32>
    %16 = vector.broadcast %15 : vector<1x128xf32> to vector<8x128xf32>
    %17 = arith.addf %14, %16 : vector<8x128xf32>
    %cst_16 = arith.constant 0.000000e+00 : f32
    %18 = vector.broadcast %cst_16 : f32 to vector<8x128xf32>
    %19 = arith.maximumf %17, %18 : vector<8x128xf32>
    %c1_17 = arith.constant 1 : index
    %c0_18 = arith.constant 0 : index
    %c0_19 = arith.constant 0 : index
    %20 = vector.load %arg5[%c1_17, %c0_18, %c0_19] : memref<3x128x128xf32, #tpu.memory_space<vmem>>, vector<1x128x128xf32>
    %21 = vector.shape_cast %20 : vector<1x128x128xf32> to vector<128x128xf32>
    %cst_20 = arith.constant dense<0.000000e+00> : vector<8x128xf32>
    %22 = tpu.matmul %19, %21, %cst_20 {dimension_numbers = #tpu.dot_dimension_numbers<[1], [0], [0], [1], [0, 0, 1, 1], [], []>} : vector<8x128xf32>, vector<128x128xf32>, vector<8x128xf32> -> vector<8x128xf32>
    %c2 = arith.constant 2 : index
    %c0_21 = arith.constant 0 : index
    %23 = vector.load %arg6[%c2, %c0_21] : memref<4x128xf32, #tpu.memory_space<vmem>>, vector<1x128xf32>
    %24 = vector.broadcast %23 : vector<1x128xf32> to vector<8x128xf32>
    %25 = arith.addf %22, %24 : vector<8x128xf32>
    %cst_22 = arith.constant 0.000000e+00 : f32
    %26 = vector.broadcast %cst_22 : f32 to vector<8x128xf32>
    %27 = arith.maximumf %25, %26 : vector<8x128xf32>
    %c2_23 = arith.constant 2 : index
    %c0_24 = arith.constant 0 : index
    %c0_25 = arith.constant 0 : index
    %28 = vector.load %arg5[%c2_23, %c0_24, %c0_25] : memref<3x128x128xf32, #tpu.memory_space<vmem>>, vector<1x128x128xf32>
    %29 = vector.shape_cast %28 : vector<1x128x128xf32> to vector<128x128xf32>
    %cst_26 = arith.constant dense<0.000000e+00> : vector<8x128xf32>
    %30 = tpu.matmul %27, %29, %cst_26 {dimension_numbers = #tpu.dot_dimension_numbers<[1], [0], [0], [1], [0, 0, 1, 1], [], []>} : vector<8x128xf32>, vector<128x128xf32>, vector<8x128xf32> -> vector<8x128xf32>
    %c3 = arith.constant 3 : index
    %c0_27 = arith.constant 0 : index
    %31 = vector.load %arg6[%c3, %c0_27] : memref<4x128xf32, #tpu.memory_space<vmem>>, vector<1x128xf32>
    %32 = vector.broadcast %31 : vector<1x128xf32> to vector<8x128xf32>
    %33 = arith.addf %30, %32 : vector<8x128xf32>
    %34 = vector.extract_strided_slice %33 {offsets = [0, 0], sizes = [8, 9], strides = [1, 1]} : vector<8x128xf32> to vector<8x9xf32>
    %c0_28 = arith.constant 0 : index
    %c0_29 = arith.constant 0 : index
    %35 = vector.load %arg7[%c0_28, %c0_29] : memref<8x10xf32, #tpu.memory_space<vmem>>, vector<8x9xf32>
    tpu.vector_store %arg7[%c0_28, %c0_29], %34 {strides = array<i32>} : memref<8x10xf32, #tpu.memory_space<vmem>>, vector<8x9xf32>,
    %36 = vector.extract_strided_slice %33 {offsets = [0, 9], sizes = [8, 1], strides = [1, 1]} : vector<8x128xf32> to vector<8x1xf32>
    %37 = arith.negf %36 : vector<8x1xf32>
    %38 = math.exp %37 : vector<8x1xf32>
    %cst_30 = arith.constant 1.000000e+00 : f32
    %39 = vector.broadcast %cst_30 : f32 to vector<8x1xf32>
    %40 = arith.addf %39, %38 : vector<8x1xf32>
    %41 = arith.divf %39, %40 : vector<8x1xf32>
    %c0_31 = arith.constant 0 : index
    %c9 = arith.constant 9 : index
    %42 = vector.load %arg7[%c0_31, %c9] : memref<8x10xf32, #tpu.memory_space<vmem>>, vector<8x1xf32>
    tpu.vector_store %arg7[%c0_31, %c9], %41 {strides = array<i32>} : memref<8x10xf32, #tpu.memory_space<vmem>>, vector<8x1xf32>,
    return
  }
  func.func @transform_0(%arg0: i32) -> (i32, i32) {
    %c0_i32 = arith.constant 0 : i32
    %c0_i32_0 = arith.constant 0 : i32
    return %arg0, %c0_i32 : i32, i32
  }
  func.func @transform_1(%arg0: i32) -> (i32, i32) {
    %c0_i32 = arith.constant 0 : i32
    %c0_i32_0 = arith.constant 0 : i32
    return %arg0, %c0_i32 : i32, i32
  }
  func.func @transform_2(%arg0: i32) -> (i32, i32) {
    %c0_i32 = arith.constant 0 : i32
    %c0_i32_0 = arith.constant 0 : i32
    %c0_i32_1 = arith.constant 0 : i32
    return %c0_i32, %c0_i32_0 : i32, i32
  }
  func.func @transform_3(%arg0: i32) -> (i32, i32) {
    %c0_i32 = arith.constant 0 : i32
    %c0_i32_0 = arith.constant 0 : i32
    %c0_i32_1 = arith.constant 0 : i32
    return %c0_i32, %c0_i32_0 : i32, i32
  }
  func.func @transform_4(%arg0: i32) -> (i32, i32, i32) {
    %c0_i32 = arith.constant 0 : i32
    %c0_i32_0 = arith.constant 0 : i32
    %c0_i32_1 = arith.constant 0 : i32
    %c0_i32_2 = arith.constant 0 : i32
    return %c0_i32, %c0_i32_0, %c0_i32_1 : i32, i32, i32
  }
  func.func @transform_5(%arg0: i32) -> (i32, i32) {
    %c0_i32 = arith.constant 0 : i32
    %c0_i32_0 = arith.constant 0 : i32
    %c0_i32_1 = arith.constant 0 : i32
    return %c0_i32, %c0_i32_0 : i32, i32
  }
  func.func @transform_6(%arg0: i32) -> (i32, i32) {
    %c0_i32 = arith.constant 0 : i32
    %c0_i32_0 = arith.constant 0 : i32
    return %arg0, %c0_i32 : i32, i32
  }
}

</mosaic_0001>

<bundles_post_ra>
// kernel: forward.1
= control target key start
LH: loop header
LB: loop body
LE: loop exit
PB: predicated region body
PF: predicated region fallthrough
CT: control target
= control target key end

     0   :  { %11 = vsyncpa [#allocation3], 0  ;;  %s871_s0 = inlined_call_operand.vmem [shape: f32[8,8], index: 0, kind: input, shape index: {}]   ;;  %s872_s1 = inlined_call_operand.vmem [shape: f32[8,4], index: 1, kind: input, shape index: {}]   ;;  %s873_s2 = inlined_call_operand.hbm [shape: f32[8,128], index: 2, kind: input, shape index: {}]   ;;  %s874_s3 = inlined_call_operand.vmem [shape: f32[4,128], index: 3, kind: input, shape index: {}]   ;;  %s875_s4 = inlined_call_operand.hbm [shape: f32[3,128,128], index: 4, kind: input, shape index: {}]   ;;  %s876_s5 = inlined_call_operand.vmem [shape: f32[4,128], index: 5, kind: input, shape index: {}]   ;;  %s877_s6 = inlined_call_operand.vmem [shape: f32[8,10], index: 6, kind: output, shape index: {}]  }
   0x1   :  { %12 = vsyncpa [#allocation5], 0  ;;  %s737_s21 = smov [#allocation2]   ;;  %s738_s23 = smov [#allocation4]  }
   0x2   :  { %s23_s22 = sshll.u32 %s737_s21, 4  ;;  %s34_s24 = sshll.u32 %s738_s23, 4  ;;  %s24_s22 = int_to_ptr.vmem [resolvable:$true] %s23_s22  ;;  %s35_s24 = int_to_ptr.vmem [resolvable:$true] %s34_s24 }
   0x3   :  { %s701_s25 = scalar_lea.vmem %s24_s22, 128  ;;  %p706_p1 = scmp.lt.s32.totalorder %s24_s22, %s24_s22 }
   0x4   :  { %p702_p0 = scmp.ne.s32.totalorder %s24_s22, %s701_s25  ;;  %p707_p2 = scmp.lt.s32.totalorder %s701_s25, %s701_s25 }
   0x6   :  { %p708_p3 = por %p707_p2, %p706_p1 }
   0x8   :  { %p709_p4 = pnand %p708_p3, %p702_p0 }
   0xa   :  { %712 = shalt.err (!%p709_p4)
}
   0xb   :  { %26 = dma.hbm_to_vmem [thread:$0]  %s873_s2, 128, %s24_s22, [#allocation3]  }
   0xc   :  { %s721_s28 = scalar_lea.vmem %s35_s24, 6144  ;;  %p726_p6 = scmp.lt.s32.totalorder %s35_s24, %s35_s24 }
   0xd   :  { %p722_p5 = scmp.ne.s32.totalorder %s35_s24, %s721_s28  ;;  %p727_p7 = scmp.lt.s32.totalorder %s721_s28, %s721_s28 }
   0xf   :  { %p728_p8 = por %p727_p7, %p726_p6 }
  0x11   :  { %p729_p9 = pnand %p728_p8, %p722_p5 }
  0x13   :  { %732 = shalt.err (!%p729_p9)
}
  0x14   :  { %s739_s29 = smov 128   ;;  %s740_s30 = smov 8  }
  0x15   :  { %40 = dma.hbm_to_vmem [thread:$0]  %s875_s4, 6144, %s35_s24, [#allocation5], %s739_s29, %s739_s29, %s740_s30  }
  0x16   :  { %733 = dma.done.wait [#allocation3], 128  }
  0x17   :  { %734 = vsyncadd [#allocation3], 4294967168 }
  0x18   :  { %735 = dma.done.wait [#allocation5], 6144  }
  0x19   :  { %736 = vsyncadd [#allocation5], 4294961152  ;;  %v741_v0 = vmov 0.0   ;;  %vm742_vm0 = vmmov 0   ;;  %vm57_vm1 = vcmask 1043456   ;;  %vm53_vm2 = vcmask 31744  }
  0x1a   :  { %568 = vmatprep.subr.mxu1 %v741_v0  ;;  %570 = vmatprep.mubr.msk.f32.mxu1 %vm742_vm0, %v741_v0  ;;  %v52_v1 = vld [vmem:[%s874_s3] sm:$0xf]  ;;  %vm131_vm3 = vcmask 64512   ;;  %v226_v6 = vld [vmem:[#allocation4 + $0x70] sm:$0xff]  ;;  %v225_v7 = vld [vmem:[#allocation4 + $0x68] sm:$0xff]  ;;  %vm489_vm4 = vcmask 72704  }
  0x1b   :  { %578 = vmatprep.subr.mxu0 %v741_v0  ;;  %610 = vmatprep.mubr.msk.f32.mxu0 %vm742_vm0, %v741_v0  ;;  %v51_v2 = vld [vmem:[%s872_s1] sm:$0xff]  ;;  %v224_v8 = vld [vmem:[#allocation4 + $0x60] sm:$0xff]  ;;  %v222_v10 = vld [vmem:[#allocation4 + $0x50] sm:$0xff]  ;;  %vm497_vm5 = vcmask 80968  }
  0x1c   :  { %v50_v3 = vld [vmem:[#allocation2] sm:$0xff]  ;;  %569 = vmatpush3.msk.msra.mxu1 %vm57_vm1, %v52_v1  ;;  %v221_v11 = vld [vmem:[#allocation4 + $0x48] sm:$0xff]  ;;  %v220_v12 = vld [vmem:[#allocation4 + $0x40] sm:$0xff] }
  0x1d   :  { %v227_v4 = vld [vmem:[#allocation4 + $0x78] sm:$0xff]  ;;  %571 = vmatmul.mubr.msk.f32.vlgmr.msra.gmra.mxu1 %vm53_vm2, %v51_v2  ;;  %573 = vmatprep.subr.mxu1 %v741_v0  ;;  %v218_v14 = vld [vmem:[#allocation4 + $0x30] sm:$0xff]  ;;  %v217_v15 = vld [vmem:[#allocation4 + $0x28] sm:$0xff] }
  0x1e   :  { %574 = vmatpush3.msra.mxu1 %v50_v3  ;;  %575 = vmatprep.mubr.msk.f32.mxu1 %vm742_vm0, %v741_v0  ;;  %v49_v5 = vld [vmem:[%s871_s0] sm:$0xff]  ;;  %v216_v16 = vld [vmem:[#allocation4 + $0x20] sm:$0xff]  ;;  %v214_v18 = vld [vmem:[#allocation4 + $0x10] sm:$0xff] }
  0x1f   :  { %579 = vmatpush3.msra.mxu0 %v227_v4  ;;  %613 = vmatprep.subr.mxu1 %v741_v0  ;;  %v223_v9 = vld [vmem:[#allocation4 + $0x58] sm:$0xff]  ;;  %v213_v19 = vld [vmem:[#allocation4 + $0x8] sm:$0xff]  ;;  %v212_v20 = vld [vmem:[#allocation4] sm:$0xff] }
  0x20   :  { %580 = vmatprep.subr.mxu0 %v741_v0  ;;  %v219_v13 = vld [vmem:[#allocation4 + $0x38] sm:$0xff]  ;;  %v319_v22 = vld [vmem:[#allocation4 + $0xf0] sm:$0xff]  ;;  %v318_v23 = vld [vmem:[#allocation4 + $0xe8] sm:$0xff] }
  0x21   :  { %576 = vmatmul.mubr.msk.f32.vlgmr.msra.gmra.mxu1 %vm131_vm3, %v49_v5  ;;  %581 = vmatpush3.msra.mxu0 %v226_v6  ;;  %v215_v17 = vld [vmem:[#allocation4 + $0x18] sm:$0xff]  ;;  %v317_v24 = vld [vmem:[#allocation4 + $0xe0] sm:$0xff]  ;;  %v315_v26 = vld [vmem:[#allocation4 + $0xd0] sm:$0xff] }
  0x22   :  { %582 = vmatprep.subr.mxu0 %v741_v0  ;;  %645 = vmatprep.mubr.msk.f32.mxu1 %vm742_vm0, %v741_v0  ;;  %v320_v21 = vld [vmem:[#allocation4 + $0xf8] sm:$0xff]  ;;  %v314_v27 = vld [vmem:[#allocation4 + $0xc8] sm:$0xff]  ;;  %v313_v28 = vld [vmem:[#allocation4 + $0xc0] sm:$0xff] }
  0x23   :  { %583 = vmatpush3.msra.mxu0 %v225_v7  ;;  %614 = vmatpush3.msra.mxu1 %v320_v21  ;;  %v316_v25 = vld [vmem:[#allocation4 + $0xd8] sm:$0xff]  ;;  %v311_v30 = vld [vmem:[#allocation4 + $0xb0] sm:$0xff]  ;;  %v310_v31 = vld [vmem:[#allocation4 + $0xa8] sm:$0xff] }
  0x24   :  { %584 = vmatprep.subr.mxu0 %v741_v0  ;;  %615 = vmatprep.subr.mxu1 %v741_v0  ;;  %v312_v29 = vld [vmem:[#allocation4 + $0xb8] sm:$0xff]  ;;  %v309_v32 = vld [vmem:[#allocation4 + $0xa0] sm:$0xff]  ;;  %v307_v42 = vld [vmem:[#allocation4 + $0x90] sm:$0xff] }
  0x25   :  { %585 = vmatpush3.msra.mxu0 %v224_v8  ;;  %616 = vmatpush3.msra.mxu1 %v319_v22  ;;  %v308_v33 = vld [vmem:[#allocation4 + $0x98] sm:$0xff]  ;;  %v306_v43 = vld [vmem:[#allocation4 + $0x88] sm:$0xff]  ;;  %v305_v44 = vld [vmem:[#allocation4 + $0x80] sm:$0xff] }
  0x26   :  { %586 = vmatprep.subr.mxu0 %v741_v0  ;;  %617 = vmatprep.subr.mxu1 %v741_v0  ;;  %v508_v37 = vld [vmem:[%s876_s5] ss:$0 sm:$0xff]  ;;  %v412_v46 = vld [vmem:[#allocation4 + $0x170] sm:$0xff]  ;;  %v411_v47 = vld [vmem:[#allocation4 + $0x168] sm:$0xff] }
  0x27   :  { %587 = vmatpush3.msra.mxu0 %v223_v9  ;;  %618 = vmatpush3.msra.mxu1 %v318_v23  ;;  %v413_v45 = vld [vmem:[#allocation4 + $0x178] sm:$0xff]  ;;  %v410_v48 = vld [vmem:[#allocation4 + $0x160] sm:$0xff]  ;;  %v408_v50 = vld [vmem:[#allocation4 + $0x150] sm:$0xff] }
  0x28   :  { %588 = vmatprep.subr.mxu0 %v741_v0  ;;  %619 = vmatprep.subr.mxu1 %v741_v0  ;;  %v409_v49 = vld [vmem:[#allocation4 + $0x158] sm:$0xff]  ;;  %v407_v51 = vld [vmem:[#allocation4 + $0x148] sm:$0xff]  ;;  %v406_v52 = vld [vmem:[#allocation4 + $0x140] sm:$0xff] }
  0x29   :  { %589 = vmatpush3.msra.mxu0 %v222_v10  ;;  %620 = vmatpush3.msra.mxu1 %v317_v24  ;;  %v405_v53 = vld [vmem:[#allocation4 + $0x138] sm:$0xff]  ;;  %v404_v54 = vld [vmem:[#allocation4 + $0x130] sm:$0xff]  ;;  %v403_v55 = vld [vmem:[#allocation4 + $0x128] sm:$0xff] }
  0x2a   :  { %590 = vmatprep.subr.mxu0 %v741_v0  ;;  %621 = vmatprep.subr.mxu1 %v741_v0  ;;  %v402_v56 = vld [vmem:[#allocation4 + $0x120] sm:$0xff]  ;;  %v401_v57 = vld [vmem:[#allocation4 + $0x118] sm:$0xff]  ;;  %v400_v63 = vld [vmem:[#allocation4 + $0x110] sm:$0xff] }
  0x2b   :  { %591 = vmatpush3.msra.mxu0 %v221_v11  ;;  %622 = vmatpush3.msra.mxu1 %v316_v25  ;;  %v509_v58 = vld [vmem:[%s876_s5 + $0x1] ss:$0 sm:$0xff]  ;;  %v399_v1 = vld [vmem:[#allocation4 + $0x108] sm:$0xff]  ;;  %v398_v2 = vld [vmem:[#allocation4 + $0x100] sm:$0xff] }
  0x2c   :  { %592 = vmatprep.subr.mxu0 %v741_v0  ;;  %623 = vmatprep.subr.mxu1 %v741_v0  ;;  %v510_v3 = vld [vmem:[%s876_s5 + $0x2] ss:$0 sm:$0xff]  ;;  %v511_v8 = vld [vmem:[%s876_s5 + $0x3] ss:$0 sm:$0xff] }
  0x2d   :  { %593 = vmatpush3.msra.mxu0 %v220_v12  ;;  %624 = vmatpush3.msra.mxu1 %v315_v26 }
  0x2e   :  { %594 = vmatprep.subr.mxu0 %v741_v0  ;;  %625 = vmatprep.subr.mxu1 %v741_v0 }
  0x2f   :  { %595 = vmatpush3.msra.mxu0 %v219_v13  ;;  %626 = vmatpush3.msra.mxu1 %v314_v27 }
  0x30   :  { %596 = vmatprep.subr.mxu0 %v741_v0  ;;  %627 = vmatprep.subr.mxu1 %v741_v0 }
  0x31   :  { %597 = vmatpush3.msra.mxu0 %v218_v14  ;;  %628 = vmatpush3.msra.mxu1 %v313_v28 }
  0x32   :  { %598 = vmatprep.subr.mxu0 %v741_v0  ;;  %629 = vmatprep.subr.mxu1 %v741_v0 }
  0x33   :  { %599 = vmatpush3.msra.mxu0 %v217_v15  ;;  %630 = vmatpush3.msra.mxu1 %v312_v29 }
  0x34   :  { %600 = vmatprep.subr.mxu0 %v741_v0  ;;  %631 = vmatprep.subr.mxu1 %v741_v0 }
  0x35   :  { %601 = vmatpush3.msra.mxu0 %v216_v16  ;;  %632 = vmatpush3.msra.mxu1 %v311_v30 }
  0x36   :  { %602 = vmatprep.subr.mxu0 %v741_v0  ;;  %633 = vmatprep.subr.mxu1 %v741_v0 }
  0x37   :  { %603 = vmatpush3.msra.mxu0 %v215_v17  ;;  %634 = vmatpush3.msra.mxu1 %v310_v31 }
  0x38   :  { %604 = vmatprep.subr.mxu0 %v741_v0  ;;  %635 = vmatprep.subr.mxu1 %v741_v0 }
  0x39   :  { %605 = vmatpush3.msra.mxu0 %v214_v18  ;;  %636 = vmatpush3.msra.mxu1 %v309_v32 }
  0x3a   :  { %606 = vmatprep.subr.mxu0 %v741_v0  ;;  %637 = vmatprep.subr.mxu1 %v741_v0 }
  0x3b   :  { %607 = vmatpush3.msra.mxu0 %v213_v19  ;;  %638 = vmatpush3.msra.mxu1 %v308_v33 }
  0x3c   :  { %608 = vmatprep.subr.mxu0 %v741_v0  ;;  %639 = vmatprep.subr.mxu1 %v741_v0 }
  0x3d   :  { %609 = vmatpush3.msra.mxu0 %v212_v20  ;;  %640 = vmatpush3.msra.mxu1 %v307_v42 }
  0x3e   :  { %648 = vmatprep.subr.mxu0 %v741_v0  ;;  %641 = vmatprep.subr.mxu1 %v741_v0 }
  0x3f   :  { %642 = vmatpush3.msra.mxu1 %v306_v43 }
  0x40   :  { %643 = vmatprep.subr.mxu1 %v741_v0 }
  0x41   :  { %644 = vmatpush3.msra.mxu1 %v305_v44 }
  0xdd   :  { %v127_v34 = vpop.f32.mrf.mxu1 }
  0xdf   :  { %v572_v35 = vpop.f32.mrf.mxu1 }
  0xe1   :  { %v201_v36 = vpop.f32.mrf.mxu1 }
  0xe2   :  { %v202_v38 = vadd.f32 %v201_v36, %v127_v34 }
  0xe3   :  { %v577_v39 = vpop.f32.mrf.mxu1 }
  0xe4   :  { %v210_v40 = vadd.f32 %v508_v37, %v202_v38 }
  0xe6   :  { %v211_v41 = vmax.f32 %v210_v40, 0.0 }
  0xe8   :  { %611 = vmatmul.mubr.f32.vlgmr.msra.gmra.mxu0 %v211_v41 }
  0xe9   :  { %680 = vmatprep.mubr.msk.f32.mxu0 %vm742_vm0, %v741_v0  ;;  %649 = vmatpush3.msra.mxu0 %v413_v45 }
  0xea   :  { %650 = vmatprep.subr.mxu0 %v741_v0 }
  0xeb   :  { %651 = vmatpush3.msra.mxu0 %v412_v46 }
  0xec   :  { %652 = vmatprep.subr.mxu0 %v741_v0 }
  0xed   :  { %653 = vmatpush3.msra.mxu0 %v411_v47 }
  0xee   :  { %654 = vmatprep.subr.mxu0 %v741_v0 }
  0xef   :  { %655 = vmatpush3.msra.mxu0 %v410_v48 }
  0xf0   :  { %656 = vmatprep.subr.mxu0 %v741_v0 }
  0xf1   :  { %657 = vmatpush3.msra.mxu0 %v409_v49 }
  0xf2   :  { %658 = vmatprep.subr.mxu0 %v741_v0 }
  0xf3   :  { %659 = vmatpush3.msra.mxu0 %v408_v50 }
  0xf4   :  { %660 = vmatprep.subr.mxu0 %v741_v0 }
  0xf5   :  { %661 = vmatpush3.msra.mxu0 %v407_v51 }
  0xf6   :  { %662 = vmatprep.subr.mxu0 %v741_v0 }
  0xf7   :  { %663 = vmatpush3.msra.mxu0 %v406_v52 }
  0xf8   :  { %664 = vmatprep.subr.mxu0 %v741_v0 }
  0xf9   :  { %665 = vmatpush3.msra.mxu0 %v405_v53 }
  0xfa   :  { %666 = vmatprep.subr.mxu0 %v741_v0 }
  0xfb   :  { %667 = vmatpush3.msra.mxu0 %v404_v54 }
  0xfc   :  { %668 = vmatprep.subr.mxu0 %v741_v0 }
  0xfd   :  { %669 = vmatpush3.msra.mxu0 %v403_v55 }
  0xfe   :  { %670 = vmatprep.subr.mxu0 %v741_v0 }
  0xff   :  { %671 = vmatpush3.msra.mxu0 %v402_v56 }
 0x100   :  { %672 = vmatprep.subr.mxu0 %v741_v0 }
 0x101   :  { %673 = vmatpush3.msra.mxu0 %v401_v57 }
 0x102   :  { %674 = vmatprep.subr.mxu0 %v741_v0 }
 0x103   :  { %675 = vmatpush3.msra.mxu0 %v400_v63 }
 0x104   :  { %676 = vmatprep.subr.mxu0 %v741_v0 }
 0x105   :  { %677 = vmatpush3.msra.mxu0 %v399_v1 }
 0x106   :  { %678 = vmatprep.subr.mxu0 %v741_v0 }
 0x107   :  { %679 = vmatpush3.msra.mxu0 %v398_v2 }
 0x1a8   :  { %v299_v59 = vpop.f32.mrf.mxu0 }
 0x1a9   :  { %v300_v60 = vadd.f32 %v509_v58, %v299_v59 }
 0x1aa   :  { %v612_v61 = vpop.f32.mrf.mxu0 }
 0x1ab   :  { %v303_v62 = vmax.f32 %v300_v60, 0.0 }
 0x1ad   :  { %646 = vmatmul.mubr.f32.vlgmr.msra.gmra.mxu1 %v303_v62 }
 0x26d   :  { %v392_v4 = vpop.f32.mrf.mxu1 }
 0x26e   :  { %v393_v5 = vadd.f32 %v510_v3, %v392_v4 }
 0x26f   :  { %v647_v6 = vpop.f32.mrf.mxu1 }
 0x270   :  { %v396_v7 = vmax.f32 %v393_v5, 0.0 }
 0x272   :  { %681 = vmatmul.mubr.f32.vlgmr.msra.gmra.mxu0 %v396_v7 }
 0x332   :  { %v485_v9 = vpop.f32.mrf.mxu0 }
 0x333   :  { %v486_v10 = vadd.f32 %v511_v8, %v485_v9 }
 0x334   :  { %v682_v11 = vpop.f32.mrf.mxu0 }
 0x335   :  { %490 = vst.msk [vmem:[%s877_s6] sm:$0xff] %vm489_vm4, %v486_v10  ;;  %v512_v0 = vmul.f32 -1.442695, %v486_v10 }
 0x337   :  { %689 = vpow2.f32 %v512_v0 }
 0x344   :  { %v690_v12 = vpop.eup %689 }
 0x345   :  { %v494_v13 = vadd.f32 1.0, %v690_v12 }
 0x347   :  { %691 = vrcp.f32 %v494_v13 }
 0x354   :  { %v692_v14 = vpop.eup %691 }
 0x355   :  { %498 = vst.msk [vmem:[%s877_s6] sm:$0xff] %vm497_vm5, %v692_v14 }
 0x356   :  { %503 = vsyncpa [#allocation3], 1 }
 0x357   :  { %504 = vsyncpa [#allocation5], 1 }

</bundles_post_ra>
